<compile_context>
chip_gen: v7x
topology: tpu7x:2x2x1
jax: 0.10.0
libtpu: 0.0.40
codegen_flags: <defaults>
</compile_context>

<pallas_src>
import functools
import math

import jax
import jax.numpy as jnp
import numpy as np
from jax.experimental import pallas as pl
from jax.experimental.pallas import tpu as pltpu


def _cdiv(a, b):
    return -(-a // b)


# ---------------------------------------------------------------------------
# Kernels
# ---------------------------------------------------------------------------
def _upsample_fused_kernel(x_ref, w_ref, o_ref, *, cout, tr, w_cols):
    """Fused tap compute + NCHW scatter.

    x_ref: (BN, Cin, TM)      flattened-pixel tile, TM = tr * w_cols (row aligned)
    w_ref: (4*Cout, Cin)      tap-major fused weight, row = (ki*2 + kj)*Cout + co
    o_ref: (BN, Cout, 4*TM)   flat view of the (Cout, 2*tr, 2*W) output tile
    """
    wf = w_ref[...]
    tm = tr * w_cols
    for b in range(x_ref.shape[0]):                      # static unroll over images
        x = x_ref[b]                                      # (Cin, TM)
        y = jnp.dot(wf, x, preferred_element_type=jnp.float32)  # (4*Cout, TM) f32
        y00 = y[0 * cout:1 * cout]                        # tap (ki=0, kj=0)
        y01 = y[1 * cout:2 * cout]                        # tap (ki=0, kj=1)
        y10 = y[2 * cout:3 * cout]                        # tap (ki=1, kj=0)
        y11 = y[3 * cout:4 * cout]                        # tap (ki=1, kj=1)
        # kj interleave on the lane axis: z_ki[:, 2*p + kj] = y_{ki,kj}[:, p]
        z0 = jnp.stack([y00, y01], axis=-1).reshape(cout, 2 * tm)
        z1 = jnp.stack([y10, y11], axis=-1).reshape(cout, 2 * tm)
        # ki interleave at output-row (2W-chunk) granularity.
        o = jnp.stack([z0.reshape(cout, tr, 2 * w_cols),
                       z1.reshape(cout, tr, 2 * w_cols)], axis=2)  # (Cout, tr, 2, 2W)
        o_ref[b] = o.reshape(cout, 4 * tm).astype(o_ref.dtype)


def _upsample_taps_kernel(x_ref, w_ref, o_ref):
    """Fallback: tap-packed output (scatter into NCHW done by XLA afterwards)."""
    wf = w_ref[...]
    for b in range(x_ref.shape[0]):
        y = jnp.dot(wf, x_ref[b], preferred_element_type=jnp.float32)
        o_ref[b] = y.astype(o_ref.dtype)


# ---------------------------------------------------------------------------
# pallas_call wrapper (shared by the fused and fallback paths)
# ---------------------------------------------------------------------------
def _pallas_upsample(x_flat, w_fused, *, cout, h, w, bn, tr, out_dtype,
                     vmem_limit, fused):
    n, cin, hw = x_flat.shape
    q = 4 * cout
    tm = tr * w
    grid = (_cdiv(n, bn), _cdiv(h, tr))
    in_specs = [
        pl.BlockSpec((bn, cin, tm), lambda nb, r: (nb, 0, r)),   # lane-dense input
        pl.BlockSpec((q, cin), lambda nb, r: (0, 0)),            # weight stays resident
    ]
    if fused:
        kernel = functools.partial(_upsample_fused_kernel, cout=cout, tr=tr, w_cols=w)
        out_shape = jax.ShapeDtypeStruct((n, cout, 4 * hw), out_dtype)
        out_spec = pl.BlockSpec((bn, cout, 4 * tm), lambda nb, r: (nb, 0, r))
    else:
        kernel = _upsample_taps_kernel
        out_shape = jax.ShapeDtypeStruct((n, q, hw), out_dtype)
        out_spec = pl.BlockSpec((bn, q, tm), lambda nb, r: (nb, 0, r))
    return pl.pallas_call(
        kernel,
        out_shape=out_shape,
        grid_spec=pltpu.PrefetchScalarGridSpec(
            num_scalar_prefetch=0,
            grid=grid,
            in_specs=in_specs,
            out_specs=out_spec,
        ),
        compiler_params=pltpu.CompilerParams(
            dimension_semantics=("parallel", "parallel"),
            vmem_limit_bytes=int(vmem_limit),
        ),
    )(x_flat, w_fused)


# ---------------------------------------------------------------------------
# Tiling / budgeting
# ---------------------------------------------------------------------------
def _vmem_budget():
    """(block_budget_bytes, vmem_limit_bytes) derived from the actual chip."""
    try:
        cap = int(getattr(pltpu.get_tpu_info(), "vmem_capacity_bytes", 64 << 20))
    except Exception:
        cap = 64 << 20                                  # conservative (v7x-sized)
    block_budget = min(48 << 20, (2 * cap) // 5)        # in+out blocks + kernel temps
    vmem_limit = min((4 * cap) // 5, max(64 << 20, block_budget + (16 << 20)))
    return block_budget, vmem_limit


def _choose_tiles(n, cin, cout, h, w, itemsize, block_budget, row_tile=None):
    q = 4 * cout
    # VMEM per input pixel per image in a grid step: double-buffered input +
    # output blocks, plus the fused kernel's f32 temporaries (~3 output-sized
    # arrays: y, z0/z1, o).
    vmem_per_pixel = 2 * (cin + q) * itemsize + 3 * q * 4
    hbm_per_pixel = (cin + q) * itemsize                 # actual HBM bytes moved

    # Row quantum so TM = tr*W is a multiple of 128 (lane-dense, legal block)
    # unless a tile covers the whole image (tr == H).
    tr_quant = 128 // math.gcd(w, 128)

    if row_tile is not None:
        tr = int(row_tile)
        assert 1 <= tr <= h
        assert tr == h or (tr * w) % 128 == 0, (
            "row_tile * W must be a multiple of 128 (or row_tile == H)")
    elif tr_quant >= h:
        tr = h
    else:
        max_rows = max(block_budget // (w * vmem_per_pixel), 1)
        tr = min(h, max(tr_quant, (max_rows // tr_quant) * tr_quant))

    # Batch blocking: group small images so every grid step moves >= ~1 MiB of
    # HBM traffic (amortizes ~0.35 us/step overhead), within the VMEM budget.
    bn = max(1, min(n, 8, _cdiv(1 << 20, tr * w * hbm_per_pixel)))
    while bn > 1 and bn * tr * w * vmem_per_pixel > block_budget:
        bn -= 1

    # Keep >= 2 grid blocks when there is enough work, so both v7x TensorCores
    # get a "parallel" block (harmless on single-core v5e/v6e).
    if _cdiv(n, bn) * _cdiv(h, tr) < 2:
        if n > 1:
            bn = _cdiv(n, 2)
        elif row_tile is None and tr == h and h >= 2 * tr_quant:
            tr = max(tr_quant, (((h + 1) // 2) // tr_quant) * tr_quant)
    return bn, tr


# ---------------------------------------------------------------------------
# Fused-scatter capability probe (one-time, cached)
# ---------------------------------------------------------------------------
_FUSED_SCATTER_OK = None


def _fused_scatter_supported():
    """Check once whether the in-kernel interleave (stack+reshape) lowers on
    this Mosaic build; otherwise use the known-good tap-packed path."""
    global _FUSED_SCATTER_OK
    if _FUSED_SCATTER_OK is None:
        try:
            n, cin, cout, h, w = 2, 8, 8, 8, 16
            _, vmem_limit = _vmem_budget()
            out = _pallas_upsample(
                jnp.zeros((n, cin, h * w), jnp.float32),
                jnp.zeros((4 * cout, cin), jnp.float32),
                cout=cout, h=h, w=w, bn=2, tr=h,
                out_dtype=jnp.float32, vmem_limit=vmem_limit, fused=True)
            jax.block_until_ready(out)
            _FUSED_SCATTER_OK = True
        except Exception:
            _FUSED_SCATTER_OK = False
    return _FUSED_SCATTER_OK


# ---------------------------------------------------------------------------
# Public API
# ---------------------------------------------------------------------------
def fuse_upsample_weight(weight, dtype=None):
    """(Cin, Cout, 2, 2) PyTorch ConvTranspose2d weight -> (4*Cout, Cin),
    tap-major (row = (ki*2 + kj)*Cout + co).  Precompute once with the weights."""
    cin, cout, kh, kw = weight.shape
    assert (kh, kw) == (2, 2)
    wf = jnp.transpose(weight, (2, 3, 1, 0)).reshape(4 * cout, cin)
    return wf if dtype is None else wf.astype(dtype)


def upsample_conv_transpose2d(x, weight=None, *, w_fused=None, out_dtype=None,
                              row_tile=None):
    """ConvTranspose2d(kernel=2, stride=2, padding=0, bias=False) forward.

    x:       (N, Cin, H, W); compute/IO dtype follows x (use a bf16 x and bf16
             w_fused for the bandwidth-optimal path; accumulation stays f32).
    weight:  (Cin, Cout, 2, 2) PyTorch layout, or pass a prefused `w_fused`.
    returns: (N, Cout, 2H, 2W) in `out_dtype` (default: x.dtype).
    """
    n, cin, h, w = x.shape
    if w_fused is None:
        assert weight is not None
        w_fused = fuse_upsample_weight(weight)
    w_fused = w_fused.astype(x.dtype)
    q, cin_w = w_fused.shape
    assert cin_w == cin and q % 4 == 0
    cout = q // 4
    out_dtype = x.dtype if out_dtype is None else jnp.dtype(out_dtype)
    hw = h * w

    itemsize = max(jnp.dtype(x.dtype).itemsize, jnp.dtype(out_dtype).itemsize)
    block_budget, vmem_limit = _vmem_budget()
    bn, tr = _choose_tiles(n, cin, cout, h, w, itemsize, block_budget, row_tile)

    # NCHW -> (N, Cin, H*W) is a free view (no HBM pass over x).
    x_flat = x.reshape(n, cin, hw)

    if _fused_scatter_supported():
        out_flat = _pallas_upsample(
            x_flat, w_fused, cout=cout, h=h, w=w, bn=bn, tr=tr,
            out_dtype=out_dtype, vmem_limit=vmem_limit, fused=True)
        # The kernel already interleaved ki/kj, so (N, Cout, 4*H*W) is exactly
        # the NCHW (N, Cout, 2H, 2W) buffer: this reshape is a free view.
        return out_flat.reshape(n, cout, 2 * h, 2 * w)

    # Fallback (previous known-good path): tap-packed kernel output + one XLA
    # scatter into NCHW.
    out_t = _pallas_upsample(
        x_flat, w_fused, cout=cout, h=h, w=w, bn=bn, tr=tr,
        out_dtype=out_dtype, vmem_limit=vmem_limit, fused=False)
    out = out_t.reshape(n, 2, 2, cout, h, w)
    out = jnp.transpose(out, (0, 3, 4, 1, 5, 2)).reshape(n, cout, 2 * h, 2 * w)
    return out


def reference_conv_transpose2d(x_nchw, weight):
    n, cin, h, w = x_nchw.shape
    cout = weight.shape[1]
    out = jnp.einsum("ncij,cokl->noikjl", x_nchw, weight)
    return out.reshape(n, cout, 2 * h, 2 * w)


if __name__ == "__main__":
    key = jax.random.PRNGKey(0)
    kx, kw, kx2, kx3 = jax.random.split(key, 4)

    # Shapes consistent with the module: batch=2, channels 4 -> 8, spatial=16.
    N, Cin, Cout, H, W = 2, 4, 8, 16, 16
    x = jax.random.normal(kx, (N, Cin, H, W), dtype=jnp.float32)
    weight = jax.random.normal(kw, (Cin, Cout, 2, 2), dtype=jnp.float32) * 0.1
    ref = reference_conv_transpose2d(x, weight)

    # f32 path (exact module semantics).
    out = jax.block_until_ready(upsample_conv_transpose2d(x, weight))
    assert out.shape == (N, Cout, 2 * H, 2 * W)
    np.testing.assert_allclose(np.asarray(out), np.asarray(ref), rtol=1e-5, atol=1e-5)

    # bf16 I/O path (memory-bound op: half the HBM bytes; f32 accumulation).
    w_fused_bf16 = fuse_upsample_weight(weight, jnp.bfloat16)   # hoisted / prefused once
    out_bf = jax.block_until_ready(
        upsample_conv_transpose2d(x.astype(jnp.bfloat16), w_fused=w_fused_bf16))
    assert out_bf.dtype == jnp.bfloat16
    np.testing.assert_allclose(np.asarray(out_bf.astype(jnp.float32)),
                               np.asarray(ref), rtol=2e-2, atol=2e-2)

    # Ragged spatial (H*W = 144, not a multiple of 128) -> whole-image tile.
    x2 = jax.random.normal(kx2, (1, Cin, 12, 12), dtype=jnp.float32)
    out2 = jax.block_until_ready(upsample_conv_transpose2d(x2, weight))
    np.testing.assert_allclose(
        np.asarray(out2), np.asarray(reference_conv_transpose2d(x2, weight)),
        rtol=1e-5, atol=1e-5)

    # Multi-row-block grid with a ragged last row tile (H=20 tiled by 8 rows).
    x3 = jax.random.normal(kx3, (1, Cin, 20, 32), dtype=jnp.float32)
    out3 = jax.block_until_ready(upsample_conv_transpose2d(x3, weight, row_tile=8))
    np.testing.assert_allclose(
        np.asarray(out3), np.asarray(reference_conv_transpose2d(x3, weight)),
        rtol=1e-5, atol=1e-5)

    print("KERNEL_OK")
</pallas_src>

<mosaic_0001>
module attributes {stable_mosaic.version = 11 : i64} {
  func.func @_upsample_fused_kernel(%arg0: i32, %arg1: i32, %arg2: memref<2x8x128xf32, #tpu.memory_space<vmem>>, %arg3: memref<32x8xf32, #tpu.memory_space<vmem>>, %arg4: memref<2x8x512xf32, #tpu.memory_space<vmem>>) attributes {dimension_semantics = [#tpu.dimension_semantics<parallel>, #tpu.dimension_semantics<parallel>], iteration_bounds = array<i64: 1, 1>, scalar_prefetch = 0 : i64, scratch_operands = 0 : i64, tpu.core_type = #tpu.core_type<tc>, window_params = [{transform_indices = @transform_0, window_bounds = array<i64: 2, 8, 128>}, {pipeline_mode = #tpu.pipeline_mode<synchronous>, transform_indices = @transform_1, window_bounds = array<i64: 32, 8>}, {transform_indices = @transform_2, window_bounds = array<i64: 2, 8, 512>}]} {
    %c0 = arith.constant 0 : index
    %c0_0 = arith.constant 0 : index
    %0 = vector.load %arg3[%c0, %c0_0] : memref<32x8xf32, #tpu.memory_space<vmem>>, vector<32x8xf32>
    %c0_1 = arith.constant 0 : index
    %c0_2 = arith.constant 0 : index
    %c0_3 = arith.constant 0 : index
    %1 = vector.load %arg2[%c0_1, %c0_2, %c0_3] : memref<2x8x128xf32, #tpu.memory_space<vmem>>, vector<1x8x128xf32>
    %2 = vector.shape_cast %1 : vector<1x8x128xf32> to vector<8x128xf32>
    %cst = arith.constant dense<0.000000e+00> : vector<32x128xf32>
    %3 = tpu.matmul %0, %2, %cst {dimension_numbers = #tpu.dot_dimension_numbers<[1], [0], [0], [1], [0, 0, 1, 1], [], []>} : vector<32x8xf32>, vector<8x128xf32>, vector<32x128xf32> -> vector<32x128xf32>
    %4 = vector.extract_strided_slice %3 {offsets = [0, 0], sizes = [8, 128], strides = [1, 1]} : vector<32x128xf32> to vector<8x128xf32>
    %5 = vector.extract_strided_slice %3 {offsets = [8, 0], sizes = [8, 128], strides = [1, 1]} : vector<32x128xf32> to vector<8x128xf32>
    %6 = vector.extract_strided_slice %3 {offsets = [16, 0], sizes = [8, 128], strides = [1, 1]} : vector<32x128xf32> to vector<8x128xf32>
    %7 = vector.extract_strided_slice %3 {offsets = [24, 0], sizes = [8, 128], strides = [1, 1]} : vector<32x128xf32> to vector<8x128xf32>
    %8 = vector.shape_cast %4 : vector<8x128xf32> to vector<8x128x1xf32>
    %9 = vector.shape_cast %5 : vector<8x128xf32> to vector<8x128x1xf32>
    %10 = tpu.concatenate %8, %9 in 2 : vector<8x128x1xf32>, vector<8x128x1xf32> -> vector<8x128x2xf32>
    %11 = vector.shape_cast %10 : vector<8x128x2xf32> to vector<8x256xf32>
    %12 = vector.shape_cast %6 : vector<8x128xf32> to vector<8x128x1xf32>
    %13 = vector.shape_cast %7 : vector<8x128xf32> to vector<8x128x1xf32>
    %14 = tpu.concatenate %12, %13 in 2 : vector<8x128x1xf32>, vector<8x128x1xf32> -> vector<8x128x2xf32>
    %15 = vector.shape_cast %14 : vector<8x128x2xf32> to vector<8x256xf32>
    %16 = vector.shape_cast %11 : vector<8x256xf32> to vector<8x8x32xf32>
    %17 = vector.shape_cast %15 : vector<8x256xf32> to vector<8x8x32xf32>
    %18 = vector.shape_cast %16 : vector<8x8x32xf32> to vector<8x8x1x32xf32>
    %19 = vector.shape_cast %17 : vector<8x8x32xf32> to vector<8x8x1x32xf32>
    %20 = tpu.concatenate %18, %19 in 2 : vector<8x8x1x32xf32>, vector<8x8x1x32xf32> -> vector<8x8x2x32xf32>
    %21 = vector.shape_cast %20 : vector<8x8x2x32xf32> to vector<8x512xf32>
    %c0_4 = arith.constant 0 : index
    %c0_5 = arith.constant 0 : index
    %c0_6 = arith.constant 0 : index
    %22 = vector.load %arg4[%c0_4, %c0_5, %c0_6] : memref<2x8x512xf32, #tpu.memory_space<vmem>>, vector<1x8x512xf32>
    %23 = vector.shape_cast %22 : vector<1x8x512xf32> to vector<8x512xf32>
    %24 = vector.shape_cast %21 : vector<8x512xf32> to vector<1x8x512xf32>
    tpu.vector_store %arg4[%c0_4, %c0_5, %c0_6], %24 {strides = array<i32>} : memref<2x8x512xf32, #tpu.memory_space<vmem>>, vector<1x8x512xf32>,
    %c1 = arith.constant 1 : index
    %c0_7 = arith.constant 0 : index
    %c0_8 = arith.constant 0 : index
    %25 = vector.load %arg2[%c1, %c0_7, %c0_8] : memref<2x8x128xf32, #tpu.memory_space<vmem>>, vector<1x8x128xf32>
    %26 = vector.shape_cast %25 : vector<1x8x128xf32> to vector<8x128xf32>
    %cst_9 = arith.constant dense<0.000000e+00> : vector<32x128xf32>
    %27 = tpu.matmul %0, %26, %cst_9 {dimension_numbers = #tpu.dot_dimension_numbers<[1], [0], [0], [1], [0, 0, 1, 1], [], []>} : vector<32x8xf32>, vector<8x128xf32>, vector<32x128xf32> -> vector<32x128xf32>
    %28 = vector.extract_strided_slice %27 {offsets = [0, 0], sizes = [8, 128], strides = [1, 1]} : vector<32x128xf32> to vector<8x128xf32>
    %29 = vector.extract_strided_slice %27 {offsets = [8, 0], sizes = [8, 128], strides = [1, 1]} : vector<32x128xf32> to vector<8x128xf32>
    %30 = vector.extract_strided_slice %27 {offsets = [16, 0], sizes = [8, 128], strides = [1, 1]} : vector<32x128xf32> to vector<8x128xf32>
    %31 = vector.extract_strided_slice %27 {offsets = [24, 0], sizes = [8, 128], strides = [1, 1]} : vector<32x128xf32> to vector<8x128xf32>
    %32 = vector.shape_cast %28 : vector<8x128xf32> to vector<8x128x1xf32>
    %33 = vector.shape_cast %29 : vector<8x128xf32> to vector<8x128x1xf32>
    %34 = tpu.concatenate %32, %33 in 2 : vector<8x128x1xf32>, vector<8x128x1xf32> -> vector<8x128x2xf32>
    %35 = vector.shape_cast %34 : vector<8x128x2xf32> to vector<8x256xf32>
    %36 = vector.shape_cast %30 : vector<8x128xf32> to vector<8x128x1xf32>
    %37 = vector.shape_cast %31 : vector<8x128xf32> to vector<8x128x1xf32>
    %38 = tpu.concatenate %36, %37 in 2 : vector<8x128x1xf32>, vector<8x128x1xf32> -> vector<8x128x2xf32>
    %39 = vector.shape_cast %38 : vector<8x128x2xf32> to vector<8x256xf32>
    %40 = vector.shape_cast %35 : vector<8x256xf32> to vector<8x8x32xf32>
    %41 = vector.shape_cast %39 : vector<8x256xf32> to vector<8x8x32xf32>
    %42 = vector.shape_cast %40 : vector<8x8x32xf32> to vector<8x8x1x32xf32>
    %43 = vector.shape_cast %41 : vector<8x8x32xf32> to vector<8x8x1x32xf32>
    %44 = tpu.concatenate %42, %43 in 2 : vector<8x8x1x32xf32>, vector<8x8x1x32xf32> -> vector<8x8x2x32xf32>
    %45 = vector.shape_cast %44 : vector<8x8x2x32xf32> to vector<8x512xf32>
    %c1_10 = arith.constant 1 : index
    %c0_11 = arith.constant 0 : index
    %c0_12 = arith.constant 0 : index
    %46 = vector.load %arg4[%c1_10, %c0_11, %c0_12] : memref<2x8x512xf32, #tpu.memory_space<vmem>>, vector<1x8x512xf32>
    %47 = vector.shape_cast %46 : vector<1x8x512xf32> to vector<8x512xf32>
    %48 = vector.shape_cast %45 : vector<8x512xf32> to vector<1x8x512xf32>
    tpu.vector_store %arg4[%c1_10, %c0_11, %c0_12], %48 {strides = array<i32>} : memref<2x8x512xf32, #tpu.memory_space<vmem>>, vector<1x8x512xf32>,
    return
  }
  func.func @transform_0(%arg0: i32, %arg1: i32) -> (i32, i32, i32) {
    %c0_i32 = arith.constant 0 : i32
    %c0_i32_0 = arith.constant 0 : i32
    return %arg0, %c0_i32, %arg1 : i32, i32, i32
  }
  func.func @transform_1(%arg0: i32, %arg1: i32) -> (i32, i32) {
    %c0_i32 = arith.constant 0 : i32
    %c0_i32_0 = arith.constant 0 : i32
    %c0_i32_1 = arith.constant 0 : i32
    return %c0_i32, %c0_i32_0 : i32, i32
  }
  func.func @transform_2(%arg0: i32, %arg1: i32) -> (i32, i32, i32) {
    %c0_i32 = arith.constant 0 : i32
    %c0_i32_0 = arith.constant 0 : i32
    return %arg0, %c0_i32, %arg1 : i32, i32, i32
  }
}

module attributes {stable_mosaic.version = 11 : i64} {
  func.func @_upsample_taps_kernel(%arg0: i32, %arg1: i32, %arg2: memref<1x4x256xf32, #tpu.memory_space<vmem>>, %arg3: memref<32x4xf32, #tpu.memory_space<vmem>>, %arg4: memref<1x32x256xf32, #tpu.memory_space<vmem>>) attributes {dimension_semantics = [#tpu.dimension_semantics<parallel>, #tpu.dimension_semantics<parallel>], iteration_bounds = array<i64: 2, 1>, scalar_prefetch = 0 : i64, scratch_operands = 0 : i64, tpu.core_type = #tpu.core_type<tc>, window_params = [{transform_indices = @transform_0, window_bounds = array<i64: 1, 4, 256>}, {pipeline_mode = #tpu.pipeline_mode<synchronous>, transform_indices = @transform_1, window_bounds = array<i64: 32, 4>}, {transform_indices = @transform_2, window_bounds = array<i64: 1, 32, 256>}]} {
    %c0 = arith.constant 0 : index
    %c0_0 = arith.constant 0 : index
    %0 = vector.load %arg3[%c0, %c0_0] : memref<32x4xf32, #tpu.memory_space<vmem>>, vector<32x4xf32>
    %c0_1 = arith.constant 0 : index
    %c0_2 = arith.constant 0 : index
    %c0_3 = arith.constant 0 : index
    %1 = vector.load %arg2[%c0_1, %c0_2, %c0_3] : memref<1x4x256xf32, #tpu.memory_space<vmem>>, vector<1x4x256xf32>
    %2 = vector.shape_cast %1 : vector<1x4x256xf32> to vector<4x256xf32>
    %cst = arith.constant dense<0.000000e+00> : vector<32x256xf32>
    %3 = tpu.matmul %0, %2, %cst {dimension_numbers = #tpu.dot_dimension_numbers<[1], [0], [0], [1], [0, 0, 1, 1], [], []>} : vector<32x4xf32>, vector<4x256xf32>, vector<32x256xf32> -> vector<32x256xf32>
    %c0_4 = arith.constant 0 : index
    %c0_5 = arith.constant 0 : index
    %c0_6 = arith.constant 0 : index
    %4 = vector.load %arg4[%c0_4, %c0_5, %c0_6] : memref<1x32x256xf32, #tpu.memory_space<vmem>>, vector<1x32x256xf32>
    %5 = vector.shape_cast %4 : vector<1x32x256xf32> to vector<32x256xf32>
    %6 = vector.shape_cast %3 : vector<32x256xf32> to vector<1x32x256xf32>
    tpu.vector_store %arg4[%c0_4, %c0_5, %c0_6], %6 {strides = array<i32>} : memref<1x32x256xf32, #tpu.memory_space<vmem>>, vector<1x32x256xf32>,
    return
  }
  func.func @transform_0(%arg0: i32, %arg1: i32) -> (i32, i32, i32) {
    %c0_i32 = arith.constant 0 : i32
    %c0_i32_0 = arith.constant 0 : i32
    return %arg0, %c0_i32, %arg1 : i32, i32, i32
  }
  func.func @transform_1(%arg0: i32, %arg1: i32) -> (i32, i32) {
    %c0_i32 = arith.constant 0 : i32
    %c0_i32_0 = arith.constant 0 : i32
    %c0_i32_1 = arith.constant 0 : i32
    return %c0_i32, %c0_i32_0 : i32, i32
  }
  func.func @transform_2(%arg0: i32, %arg1: i32) -> (i32, i32, i32) {
    %c0_i32 = arith.constant 0 : i32
    %c0_i32_0 = arith.constant 0 : i32
    return %arg0, %c0_i32, %arg1 : i32, i32, i32
  }
}

</mosaic_0001>

<bundles_post_ra>
// kernel: tpu_custom_call.1
= control target key start
LH: loop header
LB: loop body
LE: loop exit
PB: predicated region body
PF: predicated region fallthrough
CT: control target
= control target key end

     0   :  { %7 = vsyncpa [#allocation3], 0  ;;  %s698_s0 = inlined_call_operand.vmem [shape: f32[2,4,256], index: 0, kind: input, shape index: {}]   ;;  %s699_s1 = inlined_call_operand.vmem [shape: f32[32,4], index: 1, kind: input, shape index: {}]   ;;  %s700_s2 = inlined_call_operand.hbm [shape: f32[2,32,256], index: 2, kind: output, shape index: {}]  }
   0x1   :  { %9 = vsyncpa [#allocation3 + $0x1], 0  ;;  %s571_s9 = smov 0   ;;  %s573_s10 = smov 0  }
   0x2   :  { %s575_s11 = smov 0   ;;  %s577_s12 = smov 0  }
   0x3   :  { %s579_s13 = smov 0   ;;  %s581_s14 = smov 0  }
   0x4 LB: > { %s390_s15 = sadd.s32 4294967295, %s550_s14   ;;  %s391_s16 = sadd.s32 4294967294, %s550_s14   ;;  %s550_s14 = sphi %s581_s14, %s15_s14   ;;  %s546_s13 = sphi %s579_s13, %s707_s13   ;;  %s542_s12 = sphi %s577_s12, %s706_s12   ;;  %s538_s11 = sphi %s575_s11, %s705_s11   ;;  %s534_s10 = sphi %s573_s10, %s704_s10   ;;  %s530_s9 = sphi %s571_s9, %s703_s9  }
   0x5   : > { %s27_s17 = sadd.s32 1, %s546_s13  ;;  %s85_s18 = sadd.s32 1, %s538_s11 }
   0x6   : > { %p29_p0 = scmp.ge.s32.totalorder %s27_s17, 2  ;;  %p95_p1 = scmp.ne.s32.totalorder %s538_s11, %s534_s10 }
   0x7   : > { %p96_p2 = scmp.eq.s32.totalorder %s390_s15, 1  ;;  %p101_p3 = scmp.ne.s32.totalorder %s534_s10, %s530_s9 }
   0x8   : > { %s709_s17 = smov (%p29_p0, %s27_s17), 0  ;;  %p102_p5 = scmp.eq.s32.totalorder %s391_s16, 1 }
   0x9   : > { %p611_p4 = por %p96_p2, %p95_p1  ;;  %s80_s20 = ssub.s32 %s546_s13, %s709_s17 }
   0xa   : > { %p394_p6 = scmp.ge.s32.totalorder %s550_s14, 1  ;;  %p83_p7 = scmp.eq.s32.totalorder %s80_s20, 0 }
   0xb   : > { %p618_p8 = por %p102_p5, %p101_p3  ;;  %p136_p9 = scmp.lt.s32.totalorder %s550_s14, 3 }
   0xc   : > { %s624_s22 = scalar_select %p83_p7, %s538_s11, %s85_s18  }
   0xd   : > { %p137_p10 = pnand %p394_p6, %p136_p9 }
   0xe   : > { %p163_p11 = scmp.lt.s32.totalorder (!%p137_p10), %s542_s12, 1  ;;  %v552_v0 = vmov (!%p137_p10), 0.0   ;;  %vm193_vm0 = vcmask (!%p137_p10), 1043456   ;;  %v173_v3 = vld [vmem:[%s699_s1] sm:$0xff] (!%p137_p10)  ;;  %vm180_vm1 = vcmask (!%p137_p10), 31744   ;;  %v175_v4 = vld [vmem:[%s699_s1 + $0x10] sm:$0xff] (!%p137_p10) }
   0xf   : > { %140 = sbr.rel (%p137_p10) target bundleno = 263 (0x107), region = 28  ;;  %262 = vmatprep.mubr.f32.mxu0 (!%p137_p10), %v552_v0  ;;  %274 = vmatprep.mubr.f32.mxu1 (!%p137_p10), %v552_v0  ;;  %v174_v5 = vld [vmem:[%s699_s1 + $0x8] sm:$0xff] (!%p137_p10)  ;;  %v176_v6 = vld [vmem:[%s699_s1 + $0x18] sm:$0xff] (!%p137_p10)  ;;  %s159_s8 = sand.u32 (!%p137_p10), 1, %s534_s10  }
  0x10   : > { %s395_s15 = sshll.u32 (!%p137_p10), %s159_s8, 6  ;;  %s410_s20 = sshll.u32 (!%p137_p10), %s542_s12, 10 }
  0x11   : > { %s161_s16 = scalar_lea.vmem (!%p137_p10), [#allocation2], %s395_s15  ;;  %s650_s25 = scalar_lea.hbm (!%p137_p10), %s700_s2, %s410_s20 }
  0x12   : > { %s311_s18 = sshll.u32 (!%p137_p10), %s161_s16, 4  ;;  %s645_s18 = int_to_ptr.vmem [resolvable:$true] %s311_s18 }
  0x13   : > { %s472_s26 = scalar_lea.vmem (!%p137_p10), %s645_s18, 1024 }
  0x14   : > { %p473_p12 = scmp.ne.s32.totalorder (!%p137_p10), %s645_s18, %s472_s26 }
  0x16   : > { %s164_s23 = scalar_select %p163_p11, %s542_s12, 1 }
  0x17   : > { %s652_s12 = scalar_lea.sflag [#allocation3], %s159_s8  ;;  %p474_p13 = pnand %p473_p12, %p611_p4 }
  0x18   : > { %s409_s24 = sshll.u32 %s164_s23, 3 }
  0x19   : > { %s170_s27 = scalar_lea.vmem %s698_s0, %s409_s24  ;;  %p475_p0 = pneg %p474_p13 }
  0x1a   : > { %v177_v1 = vld [vmem:[%s170_s27] sm:$0xff]  ;;  %s553_s27 = smov [#allocation2]  }
  0x1b   : > { %v179_v2 = vcombine.high %v177_v1, %v177_v1  ;;  %s476_s28 = sshll.u32 %s553_s27, 4  ;;  %s477_s28 = int_to_ptr.vmem [resolvable:$false] %s476_s28 }
  0x1c   : > { %s478_s29 = scalar_lea.vmem %s477_s28, 2048  ;;  %p479_p1 = scmp.lt.s32.totalorder %s645_s18, %s477_s28 }
  0x1d   : > { %398 = vmatprep.subr.msk.mxu0 %vm193_vm0, %v179_v2  ;;  %411 = vmatprep.subr.msk.mxu1 %vm193_vm0, %v179_v2  ;;  %p480_p2 = scmp.lt.s32.totalorder %s478_s29, %s472_s26 }
  0x1e   : > { %399 = vmatpush1.msk.msra.mxu0 %vm193_vm0, %v177_v1  ;;  %412 = vmatpush1.msk.msra.mxu1 %vm193_vm0, %v177_v1 }
  0x1f   : > { %400 = vmatmul.mubr.msk.f32.vlgmr.msra.gmra.mrb[0].mxu0 %vm180_vm1, %v173_v3  ;;  %402 = vmatmul.mubr.msk.f32.vlgmr.msra.gmra.mrb[0].mxu1 %vm180_vm1, %v175_v4  ;;  %p481_p3 = por %p480_p2, %p479_p1 }
  0x20   : > { %268 = vmatprep.mubr.f32.mxu0 %v552_v0  ;;  %280 = vmatprep.mubr.f32.mxu1 %v552_v0 }
  0x21   : > { %p482_p5 = pnand %p481_p3, %p475_p0 }
  0x23   : > { %401 = vmatmul.mubr.msk.f32.gmra.mrb[2].mxu0 %vm180_vm1, %v174_v5  ;;  %403 = vmatmul.mubr.msk.f32.gmra.mrb[2].mxu1 %vm180_vm1, %v176_v6 }
  0xf2   : > { %v264_v7 = vpop.f32.mrb[0].mxu0  ;;  %v276_v8 = vpop.f32.mrb[0].mxu1 }
  0xf3   : > { %287 = vst [vmem:[%s161_s16] sm:$0xff] %v264_v7  ;;  %291 = vst [vmem:[%s161_s16 + $0x20] sm:$0xff] %v276_v8  ;;  %v266_v9 = vpop.f32.mrb[1].mxu0  ;;  %v278_v10 = vpop.f32.mrb[1].mxu1 }
  0xf4   : > { %288 = vst [vmem:[%s161_s16 + $0x8] sm:$0xff] %v266_v9  ;;  %292 = vst [vmem:[%s161_s16 + $0x28] sm:$0xff] %v278_v10 }
  0xf6   : > { %v270_v11 = vpop.f32.mrb[2].mxu0  ;;  %v282_v12 = vpop.f32.mrb[2].mxu1 }
  0xf7   : > { %289 = vst [vmem:[%s161_s16 + $0x10] sm:$0xff] %v270_v11  ;;  %293 = vst [vmem:[%s161_s16 + $0x30] sm:$0xff] %v282_v12  ;;  %v272_v13 = vpop.f32.mrb[3].mxu0  ;;  %v284_v14 = vpop.f32.mrb[3].mxu1 }
  0xf8   : > { %290 = vst [vmem:[%s161_s16 + $0x18] sm:$0xff] %v272_v13  ;;  %294 = vst [vmem:[%s161_s16 + $0x38] sm:$0xff] %v284_v14 }
  0xf9   : > { %485 = shalt.err (!%p482_p5)
}
  0xfa   : > { %s486_s30 = scalar_lea.hbm %s650_s25, 1024  ;;  %s490_s5 = scalar_lea.hbm %s700_s2, 2048 }
  0xfb   : > { %p487_p6 = scmp.ne.s32.totalorder %s650_s25, %s486_s30  ;;  %p491_p10 = scmp.lt.u32.totalorder %s650_s25, %s700_s2 }
  0xfc   : > { %p492_p11 = scmp.lt.u32.totalorder %s490_s5, %s486_s30  ;;  %p494_p13 = scmp.lt.u32.totalorder %s486_s30, %s650_s25 }
  0xfd   : > { %p488_p7 = pnand %p487_p6, %p611_p4 }
  0xfe   : > { %p493_p12 = por %p492_p11, %p491_p10 }
  0xff   : > { %p489_p9 = pneg %p488_p7 }
 0x100   : > { %p495_p0 = por %p494_p13, %p493_p12 }
 0x102   : > { %p496_p1 = pnand %p495_p0, %p489_p9 }
 0x104   : > { %499 = shalt.err (!%p496_p1)
}
 0x105   : > { %s554_s8 = smov 256   ;;  %s555_s15 = smov 16  }
 0x106   : > { %413 = dma.vmem_to_hbm [thread:$0]  (%p611_p4), %s645_s18, 1024, %s650_s25, %s652_s12, %s554_s8, %s554_s8, %s555_s15  }
 0x107 PF: > { %p419_p2 = scmp.ge.s32.totalorder %s550_s14, 2  ;;  %s326_s16 = sand.u32 1, %s530_s9  }
 0x108   : > { %s327_s20 = scalar_lea.sflag [#allocation3], %s326_s16 }
 0x109   : > { %p416_p3 = pnand %p419_p2, %p618_p8 }
 0x10b   : > { %525 = dma.done.wait (!%p416_p3), %s327_s20, 1024  }
 0x10c   : > { %527 = vsyncadd (!%p416_p3), %s327_s20, 4294966272  ;;  %s15_s14 = sadd.s32 1, %s550_s14   ;;  %s703_s9 = smov %s534_s10 }
 0x10d   : > { %p12_p5 = scmp.ge.s32.totalorder %s15_s14, 4   ;;  %s704_s10 = smov %s538_s11 }
 0x10e   : > { %s705_s11 = smov %s624_s22  ;;  %s706_s12 = smov %s546_s13 }
 0x10f   : > { %s707_s13 = smov %s709_s17  ;;  %14 = sbr.rel (!%p12_p5) target bundleno = 4 (0x4), region = 63 }
 0x116   :  { %332 = vsyncpa [#allocation3], 1 }
 0x117   :  { %334 = vsyncpa [#allocation3 + $0x1], 1 }

</bundles_post_ra>
